<compile_context>
chip_gen: v7x
topology: tpu7x:2x2x1
jax: 0.10.0
libtpu: 0.0.40
codegen_flags: <defaults>
</compile_context>

<pallas_src>
import functools

import numpy as np
import jax
import jax.numpy as jnp
from jax.experimental import pallas as pl
from jax.experimental.pallas import tpu as pltpu

_LANE = 128      # lane width of a vreg
_SUBLANE = 8     # sublane count of a vreg


def _round_up(n: int, m: int) -> int:
    return ((n + m - 1) // m) * m


def _argmax_kernel(e_ref, idx_ref):
    """Per-timestep argmax over the class axis.

    e_ref  : (C_pad, TILE_T) block -- classes on sublanes, time on lanes.
    idx_ref: (1, TILE_T) int32, lane-dense -- first-occurrence argmax per column.
    """
    x = e_ref[...]                                              # (C_pad, TILE_T) f32
    c_pad = x.shape[0]

    # argmax over sublanes (first occurrence on ties, matching torch/jax).
    m = jnp.max(x, axis=0, keepdims=True)                       # (1, TILE_T)
    row = jax.lax.broadcasted_iota(jnp.int32, x.shape, 0)       # class index per element
    cand = jnp.where(x == m, row, jnp.int32(c_pad))             # sentinel for non-max
    # TODO(synk): a NaN column yields the sentinel c_pad (torch.argmax would
    #             return the NaN position); fine for finite logits.
    idx = jnp.min(cand, axis=0, keepdims=True).astype(jnp.int32)

    idx_ref[...] = idx                                          # one unmasked lane-dense store


@functools.partial(jax.jit, static_argnames=("blank",))
def ctc_greedy_indices(emission: jax.Array, *, blank: int = 0):
    """emission: (T, C) float. Returns (idx[T] int32, keep[T] bool)."""
    T, C = emission.shape

    # [C, T] layout, padded so sublanes % 8 == 0 and lanes % 128 == 0.
    c_pad = _round_up(max(C, _SUBLANE), _SUBLANE)

    # Lane-tile size: multiple of 128, capped so a block stays ~<=4 MiB (fits
    # v7x's smaller VMEM double-buffered) and grid steps can pipeline.
    max_block_bytes = 4 * 1024 * 1024
    tile_cap = max(_LANE, (max_block_bytes // (c_pad * 4)) // _LANE * _LANE)
    tile_t = min(tile_cap, 2048, _round_up(T, _LANE))
    t_pad = _round_up(T, tile_t)
    grid = (t_pad // tile_t,)

    x = emission.astype(jnp.float32).T                          # (C, T)
    x = jnp.pad(
        x,
        ((0, c_pad - C), (0, t_pad - T)),
        constant_values=jnp.finfo(jnp.float32).min,             # padding never wins argmax
    )

    idx_pad = pl.pallas_call(
        _argmax_kernel,
        out_shape=jax.ShapeDtypeStruct((1, t_pad), jnp.int32),
        grid=grid,
        in_specs=[pl.BlockSpec((c_pad, tile_t), lambda i: (0, i))],
        out_specs=pl.BlockSpec((1, tile_t), lambda i: (0, i)),
        compiler_params=pltpu.CompilerParams(
            # Time tiles are independent -> megacore sharding on v7x,
            # harmless on single-TC v5e/v6e.
            dimension_semantics=("parallel",),
        ),
    )(x)

    idx = idx_pad[0, :T]                                        # drop lane padding

    # unique_consecutive + blank filter == keep first-of-run, non-blank entries.
    # Tiny O(T) shift/compare; cheaper in-jit than a second HBM output stream
    # and avoids any tile-boundary halo/carry in the kernel.
    prev = jnp.roll(idx, 1)
    pos = jnp.arange(T)
    keep = (idx != jnp.int32(blank)) & ((pos == 0) | (idx != prev))
    return idx, keep


class GreedyCTCDecoder:
    """JAX/Pallas port of the PyTorch GreedyCTCDecoder forward."""

    def __init__(self, labels, blank: int = 0):
        self.labels = labels
        self.blank = blank

    def __call__(self, emission) -> list:
        idx, keep = ctc_greedy_indices(jnp.asarray(emission), blank=self.blank)
        jax.block_until_ready((idx, keep))
        idx_np = np.asarray(idx)
        keep_np = np.asarray(keep)
        kept = idx_np[keep_np]
        # Host-side string glue (no Pallas equivalent for Python string joins).
        joined = "".join(self.labels[int(i)] for i in kept)
        return joined.replace("|", " ").strip().split()


def _reference_decode(emission_np: np.ndarray, labels, blank: int = 0):
    """Pure numpy reference replicating the torch module semantics."""
    indices = np.argmax(emission_np, axis=-1)
    dedup = [indices[0]] + [indices[t] for t in range(1, len(indices))
                            if indices[t] != indices[t - 1]]
    dedup = [int(i) for i in dedup if i != blank]
    joined = "".join(labels[i] for i in dedup)
    return joined.replace("|", " ").strip().split()


if __name__ == "__main__":
    # 32 synthetic labels: blank '-' at index 0, '|' as word separator.
    labels = "-|abcdefghijklmnopqrstuvwxyz.,!?"
    blank = 0
    C = len(labels)

    decoder = GreedyCTCDecoder(labels, blank=blank)
    key = jax.random.PRNGKey(0)

    # Small case matching the module's (seq_len, num_labels) emission convention.
    T = 16
    emission = jax.random.normal(key, (T, C), dtype=jnp.float32)
    words = decoder(emission)
    ref_words = _reference_decode(np.asarray(emission), labels, blank=blank)
    assert words == ref_words, f"mismatch: {words} vs {ref_words}"

    # Larger case to exercise lane tiling (grid > 1) and lane padding.
    T2 = 2560
    emission2 = jax.random.normal(jax.random.PRNGKey(1), (T2, C), dtype=jnp.float32)
    words2 = decoder(emission2)
    ref_words2 = _reference_decode(np.asarray(emission2), labels, blank=blank)
    assert words2 == ref_words2, "mismatch on tiled case"

    print("KERNEL_OK")
</pallas_src>

<mosaic_0001>
module attributes {stable_mosaic.version = 11 : i64} {
  func.func @_argmax_kernel(%arg0: i32, %arg1: memref<32x128xf32, #tpu.memory_space<vmem>>, %arg2: memref<1x128xi32, #tpu.memory_space<vmem>>) attributes {dimension_semantics = [#tpu.dimension_semantics<parallel>], iteration_bounds = array<i64: 1>, scalar_prefetch = 0 : i64, scratch_operands = 0 : i64, tpu.core_type = #tpu.core_type<tc>, window_params = [{transform_indices = @transform_0, window_bounds = array<i64: 32, 128>}, {transform_indices = @transform_1, window_bounds = array<i64: 1, 128>}]} {
    %c0 = arith.constant 0 : index
    %c0_0 = arith.constant 0 : index
    %0 = vector.load %arg1[%c0, %c0_0] : memref<32x128xf32, #tpu.memory_space<vmem>>, vector<32x128xf32>
    %cst = arith.constant dense<0xFF800000> : vector<128xf32>
    %1 = vector.multi_reduction <maximumf>, %0, %cst [0] : vector<32x128xf32> to vector<128xf32>
    %2 = vector.shape_cast %1 : vector<128xf32> to vector<1x128xf32>
    %3 = tpu.iota {dimensions = array<i32: 0>} : vector<32x128xi32>
    %4 = vector.broadcast %2 : vector<1x128xf32> to vector<32x128xf32>
    %5 = arith.cmpf oeq, %0, %4 : vector<32x128xf32>
    %c32_i32 = arith.constant 32 : i32
    %6 = vector.broadcast %c32_i32 : i32 to vector<32x128xi32>
    %7 = arith.select %5, %3, %6 : vector<32x128xi1>, vector<32x128xi32>
    %cst_1 = arith.constant dense<2147483647> : vector<128xi32>
    %8 = vector.multi_reduction <minsi>, %7, %cst_1 [0] : vector<32x128xi32> to vector<128xi32>
    %9 = vector.shape_cast %8 : vector<128xi32> to vector<1x128xi32>
    %c0_2 = arith.constant 0 : index
    %c0_3 = arith.constant 0 : index
    %10 = vector.load %arg2[%c0_2, %c0_3] : memref<1x128xi32, #tpu.memory_space<vmem>>, vector<1x128xi32>
    tpu.vector_store %arg2[%c0_2, %c0_3], %9 {strides = array<i32>} : memref<1x128xi32, #tpu.memory_space<vmem>>, vector<1x128xi32>,
    return
  }
  func.func @transform_0(%arg0: i32) -> (i32, i32) {
    %c0_i32 = arith.constant 0 : i32
    %c0_i32_0 = arith.constant 0 : i32
    return %c0_i32, %arg0 : i32, i32
  }
  func.func @transform_1(%arg0: i32) -> (i32, i32) {
    %c0_i32 = arith.constant 0 : i32
    %c0_i32_0 = arith.constant 0 : i32
    return %c0_i32, %arg0 : i32, i32
  }
}

</mosaic_0001>

<bundles_post_ra>
// kernel: ctc_greedy_indices.1
= control target key start
LH: loop header
LB: loop body
LE: loop exit
PB: predicated region body
PF: predicated region fallthrough
CT: control target
= control target key end

     0   :  { %v21_v8 = vlaneseq  ;;  %s79_s0 = inlined_call_operand.vmem [shape: f32[32,128], index: 0, kind: input, shape index: {}]   ;;  %s80_s1 = inlined_call_operand.vmem [shape: s32[1,128], index: 1, kind: output, shape index: {}]  }
   0x1   :  { %v8_v0 = vld [vmem:[%s79_s0] sm:$0xff]  ;;  %v9_v1 = vld [vmem:[%s79_s0 + $0x8] sm:$0xff]  ;;  %v10_v2 = vld [vmem:[%s79_s0 + $0x10] sm:$0xff] }
   0x2   :  { %v11_v3 = vld [vmem:[%s79_s0 + $0x18] sm:$0xff]  ;;  %v12_v4 = vmax.f32 %v8_v0, %v9_v1  ;;  %v22_v11 = vshrl.u32 %v21_v8, 7 }
   0x3   :  { %v13_v5 = vmax.f32 %v10_v2, %v11_v3 }
   0x4   :  { %v23_v14 = vadd.s32 8, %v22_v11  ;;  %v24_v15 = vadd.s32 16, %v22_v11  ;;  %v25_v16 = vadd.s32 24, %v22_v11 }
   0x5   :  { %v14_v6 = vmax.f32 %v12_v4, %v13_v5 }
   0x7   :  { %v15_v7 = vrot.slane %v14_v6, 4 }
   0x9   :  { %v16_v9 = vmax.f32 %v14_v6, %v15_v7 }
   0xb   :  { %v17_v10 = vrot.slane %v16_v9, 2 }
   0xd   :  { %v18_v12 = vmax.f32 %v16_v9, %v17_v10 }
   0xf   :  { %v19_v13 = vrot.slane %v18_v12, 1 }
  0x11   :  { %v20_v17 = vmax.f32 %v18_v12, %v19_v13 }
  0x13   :  { %vm26_vm0 = vcmp.eq.f32.partialorder %v8_v0, %v20_v17  ;;  %vm27_vm1 = vcmp.eq.f32.partialorder %v9_v1, %v20_v17  ;;  %vm28_vm2 = vcmp.eq.f32.partialorder %v10_v2, %v20_v17  ;;  %vm29_vm3 = vcmp.eq.f32.partialorder %v11_v3, %v20_v17 }
  0x14   :  { %v30_v18 = vsel %vm26_vm0, %v22_v11, 32  ;;  %v31_v19 = vsel %vm27_vm1, %v23_v14, 32  ;;  %v32_v20 = vsel %vm28_vm2, %v24_v15, 32  ;;  %v33_v21 = vsel %vm29_vm3, %v25_v16, 32 }
  0x15   :  { %vm34_vm4 = vcmp.lt.s32.totalorder %v30_v18, %v31_v19  ;;  %vm36_vm5 = vcmp.lt.s32.totalorder %v32_v20, %v33_v21 }
  0x16   :  { %v35_v22 = vsel %vm34_vm4, %v30_v18, %v31_v19  ;;  %v37_v23 = vsel %vm36_vm5, %v32_v20, %v33_v21 }
  0x17   :  { %vm38_vm6 = vcmp.lt.s32.totalorder %v35_v22, %v37_v23 }
  0x18   :  { %v39_v24 = vsel %vm38_vm6, %v35_v22, %v37_v23 }
  0x19   :  { %v40_v25 = vrot.slane %v39_v24, 4 }
  0x1b   :  { %vm41_vm7 = vcmp.lt.s32.totalorder %v39_v24, %v40_v25 }
  0x1c   :  { %v42_v26 = vsel %vm41_vm7, %v39_v24, %v40_v25 }
  0x1d   :  { %v43_v27 = vrot.slane %v42_v26, 2 }
  0x1f   :  { %vm44_vm8 = vcmp.lt.s32.totalorder %v42_v26, %v43_v27 }
  0x20   :  { %v45_v28 = vsel %vm44_vm8, %v42_v26, %v43_v27 }
  0x21   :  { %v46_v29 = vrot.slane %v45_v28, 1 }
  0x23   :  { %vm47_vm9 = vcmp.lt.s32.totalorder %v45_v28, %v46_v29 }
  0x24   :  { %v48_v30 = vsel %vm47_vm9, %v45_v28, %v46_v29 }
  0x25   :  { %49 = vst [vmem:[%s80_s1] sm:$0x1] %v48_v30 }

</bundles_post_ra>
